<compile_context>
chip_gen: v7x
topology: tpu7x:2x2x1
jax: 0.10.0
libtpu: 0.0.40
codegen_flags: <defaults>
</compile_context>

<pallas_src>
import functools

import jax
import jax.numpy as jnp
from jax.experimental import pallas as pl
from jax.experimental.pallas import tpu as pltpu


# ---------------------------------------------------------------------------
# Kernels.  Grid = (batch_tiles, hidden_tiles).  The hidden (contraction of the
# second matmul) axis is the inner, "arbitrary" axis; the (tm, out_dim) output
# block is resident across it and accumulated in an f32 VMEM scratch.
# ---------------------------------------------------------------------------
def _mlp_kernel_eval(x_ref, w1_ref, w2_ref, o_ref, acc_ref):
    @pl.when(pl.program_id(1) == 0)
    def _init():
        acc_ref[...] = jnp.zeros_like(acc_ref)

    # (tm, in_dim) @ (in_dim, tk) -> (tm, tk), f32 accumulate on the MXU.
    h = jnp.dot(x_ref[...], w1_ref[...], preferred_element_type=jnp.float32)
    h = jnp.maximum(h, 0.0)
    # (tm, tk) @ (tk, out_dim) -> accumulate into (tm, out_dim).
    acc_ref[...] += jnp.dot(
        h.astype(w2_ref.dtype), w2_ref[...], preferred_element_type=jnp.float32
    )

    @pl.when(pl.program_id(1) == pl.num_programs(1) - 1)
    def _finalize():
        o_ref[...] = acc_ref[...].astype(o_ref.dtype)


def _mlp_kernel_train(x_ref, w1_ref, w2_ref, bits_ref, o_ref, acc_ref, *,
                      keep_thresh, scale):
    @pl.when(pl.program_id(1) == 0)
    def _init():
        acc_ref[...] = jnp.zeros_like(acc_ref)

    h = jnp.dot(x_ref[...], w1_ref[...], preferred_element_type=jnp.float32)
    h = jnp.maximum(h, 0.0)
    # Inverted dropout: drop with prob p (bits < thresh), scale survivors by 1/(1-p).
    keep = bits_ref[...] >= jnp.uint32(keep_thresh)
    h = jnp.where(keep, h * jnp.float32(scale), jnp.float32(0.0))
    acc_ref[...] += jnp.dot(
        h.astype(w2_ref.dtype), w2_ref[...], preferred_element_type=jnp.float32
    )

    @pl.when(pl.program_id(1) == pl.num_programs(1) - 1)
    def _finalize():
        o_ref[...] = acc_ref[...].astype(o_ref.dtype)


# ---------------------------------------------------------------------------
# Wrapper.
# ---------------------------------------------------------------------------
def prepare_mlp_weights(w1, w2, dtype=None):
    """One-time conversion of torch-layout weights.

    w1: (out_dim, in_dim), w2: (out_dim, out_dim)  ->  (in_dim, out_dim), (out_dim, out_dim)
    Done once (outside the per-call forward) so no per-call HBM transpose.
    """
    w1_t = jnp.asarray(w1).T
    w2_t = jnp.asarray(w2).T
    if dtype is not None:
        w1_t = w1_t.astype(dtype)
        w2_t = w2_t.astype(dtype)
    return w1_t, w2_t


def _pick_tile(dim, desired, align):
    """Largest tile <= desired that divides dim and is `align`-aligned; else full dim."""
    if dim <= desired:
        return dim
    t = (desired // align) * align
    while t >= align:
        if dim % t == 0:
            return t
        t -= align
    return dim


def mlp_forward(x, w1_t, w2_t, *, dropout_prob=0.1, dropout_key=None,
                tm=None, tk=None):
    """Forward pass of MLP(in_dim, out_dim, dropout_prob, bias=False).

    x:    (B, in_dim)
    w1_t: (in_dim, out_dim)   pre-transposed (see prepare_mlp_weights)
    w2_t: (out_dim, out_dim)  pre-transposed
    dropout_key: None => eval mode (dropout is identity); a PRNGKey => training mode.
    """
    B, in_dim = x.shape
    in_dim_w, hidden = w1_t.shape
    hidden2, out_dim = w2_t.shape
    assert in_dim == in_dim_w and hidden == hidden2 and hidden == out_dim

    training = (dropout_key is not None) and (dropout_prob > 0.0)
    if training and dropout_prob >= 1.0:
        # torch nn.Dropout(p=1.0) zeroes everything (avoid uint32 threshold overflow).
        return jnp.zeros((B, out_dim), x.dtype)

    # Tile selection: big MXU-friendly batch tile, 128-lane-aligned hidden tile.
    if tm is None:
        tm = _pick_tile(B, 256, 8)
    if tk is None:
        tk = _pick_tile(hidden, 512, 128)
    assert B % tm == 0 and (tm % 8 == 0 or tm == B), (B, tm)
    assert hidden % tk == 0 and (tk % 128 == 0 or tk == hidden), (hidden, tk)
    grid = (B // tm, hidden // tk)

    x_spec = pl.BlockSpec((tm, in_dim), lambda i, k: (i, 0))
    w1_spec = pl.BlockSpec((in_dim, tk), lambda i, k: (0, k))
    w2_spec = pl.BlockSpec((tk, out_dim), lambda i, k: (k, 0))
    out_spec = pl.BlockSpec((tm, out_dim), lambda i, k: (i, 0))

    itemsize = lambda a: jnp.dtype(a.dtype).itemsize
    flops = 2 * B * in_dim * hidden + 2 * B * hidden * out_dim
    bytes_accessed = (x.size * itemsize(x) + w1_t.size * itemsize(w1_t)
                      + w2_t.size * itemsize(w2_t) + B * out_dim * itemsize(x))
    cost = pl.CostEstimate(flops=flops, transcendentals=0,
                           bytes_accessed=bytes_accessed)

    compiler_params = pltpu.CompilerParams(
        dimension_semantics=("parallel", "arbitrary"),
        vmem_limit_bytes=64 * 1024 * 1024,
    )

    if training:
        # Dropout mask bits generated once in the wrapper (portable: no TPU-only PRNG
        # primitive inside the kernel), streamed in tiled like the hidden activations.
        bits = jax.random.bits(dropout_key, (B, hidden), dtype=jnp.uint32)
        keep_thresh = min(int(round(dropout_prob * 2.0 ** 32)), 2 ** 32 - 1)
        kernel = functools.partial(
            _mlp_kernel_train,
            keep_thresh=keep_thresh,
            scale=float(1.0 / (1.0 - dropout_prob)),
        )
        in_specs = [x_spec, w1_spec, w2_spec,
                    pl.BlockSpec((tm, tk), lambda i, k: (i, k))]
        args = (x, w1_t, w2_t, bits)
    else:
        kernel = _mlp_kernel_eval
        in_specs = [x_spec, w1_spec, w2_spec]
        args = (x, w1_t, w2_t)

    return pl.pallas_call(
        kernel,
        out_shape=jax.ShapeDtypeStruct((B, out_dim), x.dtype),
        grid_spec=pltpu.PrefetchScalarGridSpec(
            num_scalar_prefetch=0,
            grid=grid,
            in_specs=in_specs,
            out_specs=out_spec,
            scratch_shapes=[pltpu.VMEM((tm, out_dim), jnp.float32)],
        ),
        compiler_params=compiler_params,
        cost_estimate=cost,
    )(*args)


def init_mlp_params(key, in_dim, out_dim):
    """torch.nn.Linear default init: U(-1/sqrt(fan_in), 1/sqrt(fan_in)), torch layout."""
    k1, k2 = jax.random.split(key)
    b1 = 1.0 / jnp.sqrt(jnp.float32(in_dim))
    b2 = 1.0 / jnp.sqrt(jnp.float32(out_dim))
    w1 = jax.random.uniform(k1, (out_dim, in_dim), jnp.float32, -b1, b1)
    w2 = jax.random.uniform(k2, (out_dim, out_dim), jnp.float32, -b2, b2)
    return w1, w2


if __name__ == "__main__":
    key = jax.random.PRNGKey(0)
    k_x, k_w, k_drop = jax.random.split(key, 3)

    # Small but lane-dense (multiples of 128) demo shapes.
    B, in_dim, out_dim = 256, 128, 256
    dropout_prob = 0.1

    x = jax.random.normal(k_x, (B, in_dim), jnp.float32)
    w1, w2 = init_mlp_params(k_w, in_dim, out_dim)      # torch layout
    w1_t, w2_t = prepare_mlp_weights(w1, w2)            # one-time transpose

    # --- eval mode (dropout = identity); small tiles to exercise the (2, 2) grid.
    out = jax.block_until_ready(
        mlp_forward(x, w1_t, w2_t, dropout_prob=dropout_prob, tm=128, tk=128))
    ref = jnp.maximum(x @ w1.T, 0.0) @ w2.T
    assert out.shape == (B, out_dim)
    assert jnp.allclose(out, ref, atol=2e-2, rtol=2e-2), \
        float(jnp.max(jnp.abs(out - ref)))

    # --- training mode (dropout active): the wrapper draws the mask from k_drop,
    # so the exact same mask can be reproduced for the reference.
    out_tr = jax.block_until_ready(
        mlp_forward(x, w1_t, w2_t, dropout_prob=dropout_prob,
                    dropout_key=k_drop, tm=128, tk=128))
    bits = jax.random.bits(k_drop, (B, out_dim), dtype=jnp.uint32)
    thresh = jnp.uint32(min(int(round(dropout_prob * 2.0 ** 32)), 2 ** 32 - 1))
    h_ref = jnp.maximum(x @ w1.T, 0.0)
    h_ref = jnp.where(bits >= thresh, h_ref / (1.0 - dropout_prob), 0.0)
    ref_tr = h_ref @ w2.T
    assert out_tr.shape == (B, out_dim)
    assert jnp.allclose(out_tr, ref_tr, atol=2e-2, rtol=2e-2), \
        float(jnp.max(jnp.abs(out_tr - ref_tr)))

    # --- bf16 fast path (intended production config): bf16 weights/activations,
    # f32 MXU accumulation, default (large) tiles.
    xb = x.astype(jnp.bfloat16)
    w1b, w2b = prepare_mlp_weights(w1, w2, dtype=jnp.bfloat16)
    out_bf16 = jax.block_until_ready(
        mlp_forward(xb, w1b, w2b, dropout_prob=dropout_prob))
    assert out_bf16.shape == (B, out_dim)
    assert bool(jnp.all(jnp.isfinite(out_bf16.astype(jnp.float32))))

    print("KERNEL_OK")
</pallas_src>

<mosaic_0001>
module attributes {stable_mosaic.version = 11 : i64} {
  func.func @_mlp_kernel_eval(%arg0: i32, %arg1: i32, %arg2: memref<128x128xf32, #tpu.memory_space<vmem>>, %arg3: memref<128x128xf32, #tpu.memory_space<vmem>>, %arg4: memref<128x256xf32, #tpu.memory_space<vmem>>, %arg5: memref<128x256xf32, #tpu.memory_space<vmem>>, %arg6: memref<128x256xf32, #tpu.memory_space<vmem>>) attributes {dimension_semantics = [#tpu.dimension_semantics<parallel>, #tpu.dimension_semantics<arbitrary>], iteration_bounds = array<i64: 2, 2>, scalar_prefetch = 0 : i64, scratch_operands = 1 : i64, tpu.core_type = #tpu.core_type<tc>, window_params = [{transform_indices = @transform_0, window_bounds = array<i64: 128, 128>}, {transform_indices = @transform_1, window_bounds = array<i64: 128, 128>}, {transform_indices = @transform_2, window_bounds = array<i64: 128, 256>}, {transform_indices = @transform_3, window_bounds = array<i64: 128, 256>}]} {
    %c0_i32 = arith.constant 0 : i32
    %0 = arith.cmpi eq, %arg1, %c0_i32 : i32
    %1 = arith.extui %0 : i1 to i32
    %c0_i32_0 = arith.constant 0 : i32
    %2 = arith.cmpi ne, %1, %c0_i32_0 : i32
    scf.if %2 {
      %cst_13 = arith.constant 0.000000e+00 : f32
      %16 = vector.broadcast %cst_13 : f32 to vector<128x256xf32>
      %c0_14 = arith.constant 0 : index
      %c0_15 = arith.constant 0 : index
      %17 = vector.load %arg6[%c0_14, %c0_15] : memref<128x256xf32, #tpu.memory_space<vmem>>, vector<128x256xf32>
      tpu.vector_store %arg6[%c0_14, %c0_15], %16 {strides = array<i32>} : memref<128x256xf32, #tpu.memory_space<vmem>>, vector<128x256xf32>,
    } else {
    }
    %c0 = arith.constant 0 : index
    %c0_1 = arith.constant 0 : index
    %3 = vector.load %arg2[%c0, %c0_1] : memref<128x128xf32, #tpu.memory_space<vmem>>, vector<128x128xf32>
    %c0_2 = arith.constant 0 : index
    %c0_3 = arith.constant 0 : index
    %4 = vector.load %arg3[%c0_2, %c0_3] : memref<128x128xf32, #tpu.memory_space<vmem>>, vector<128x128xf32>
    %cst = arith.constant dense<0.000000e+00> : vector<128x128xf32>
    %5 = tpu.matmul %3, %4, %cst {dimension_numbers = #tpu.dot_dimension_numbers<[1], [0], [0], [1], [0, 0, 1, 1], [], []>} : vector<128x128xf32>, vector<128x128xf32>, vector<128x128xf32> -> vector<128x128xf32>
    %cst_4 = arith.constant 0.000000e+00 : f32
    %6 = vector.broadcast %cst_4 : f32 to vector<128x128xf32>
    %7 = arith.maximumf %5, %6 : vector<128x128xf32>
    %c0_5 = arith.constant 0 : index
    %c0_6 = arith.constant 0 : index
    %8 = vector.load %arg6[%c0_5, %c0_6] : memref<128x256xf32, #tpu.memory_space<vmem>>, vector<128x256xf32>
    %c0_7 = arith.constant 0 : index
    %c0_8 = arith.constant 0 : index
    %9 = vector.load %arg4[%c0_7, %c0_8] : memref<128x256xf32, #tpu.memory_space<vmem>>, vector<128x256xf32>
    %cst_9 = arith.constant dense<0.000000e+00> : vector<128x256xf32>
    %10 = tpu.matmul %7, %9, %cst_9 {dimension_numbers = #tpu.dot_dimension_numbers<[1], [0], [0], [1], [0, 0, 1, 1], [], []>} : vector<128x128xf32>, vector<128x256xf32>, vector<128x256xf32> -> vector<128x256xf32>
    %11 = arith.addf %8, %10 : vector<128x256xf32>
    %c0_10 = arith.constant 0 : index
    %c0_11 = arith.constant 0 : index
    %12 = vector.load %arg6[%c0_10, %c0_11] : memref<128x256xf32, #tpu.memory_space<vmem>>, vector<128x256xf32>
    tpu.vector_store %arg6[%c0_10, %c0_11], %11 {strides = array<i32>} : memref<128x256xf32, #tpu.memory_space<vmem>>, vector<128x256xf32>,
    %c1_i32 = arith.constant 1 : i32
    %13 = arith.cmpi eq, %arg1, %c1_i32 : i32
    %14 = arith.extui %13 : i1 to i32
    %c0_i32_12 = arith.constant 0 : i32
    %15 = arith.cmpi ne, %14, %c0_i32_12 : i32
    scf.if %15 {
      %c0_13 = arith.constant 0 : index
      %c0_14 = arith.constant 0 : index
      %16 = vector.load %arg6[%c0_13, %c0_14] : memref<128x256xf32, #tpu.memory_space<vmem>>, vector<128x256xf32>
      %c0_15 = arith.constant 0 : index
      %c0_16 = arith.constant 0 : index
      %17 = vector.load %arg5[%c0_15, %c0_16] : memref<128x256xf32, #tpu.memory_space<vmem>>, vector<128x256xf32>
      tpu.vector_store %arg5[%c0_15, %c0_16], %16 {strides = array<i32>} : memref<128x256xf32, #tpu.memory_space<vmem>>, vector<128x256xf32>,
    } else {
    }
    return
  }
  func.func @transform_0(%arg0: i32, %arg1: i32) -> (i32, i32) {
    %c0_i32 = arith.constant 0 : i32
    %c0_i32_0 = arith.constant 0 : i32
    return %arg0, %c0_i32 : i32, i32
  }
  func.func @transform_1(%arg0: i32, %arg1: i32) -> (i32, i32) {
    %c0_i32 = arith.constant 0 : i32
    %c0_i32_0 = arith.constant 0 : i32
    return %c0_i32, %arg1 : i32, i32
  }
  func.func @transform_2(%arg0: i32, %arg1: i32) -> (i32, i32) {
    %c0_i32 = arith.constant 0 : i32
    %c0_i32_0 = arith.constant 0 : i32
    return %arg1, %c0_i32 : i32, i32
  }
  func.func @transform_3(%arg0: i32, %arg1: i32) -> (i32, i32) {
    %c0_i32 = arith.constant 0 : i32
    %c0_i32_0 = arith.constant 0 : i32
    return %arg0, %c0_i32 : i32, i32
  }
}

</mosaic_0001>

<bundles_post_ra>
// kernel: tpu_custom_call.1
= control target key start
LH: loop header
LB: loop body
LE: loop exit
PB: predicated region body
PF: predicated region fallthrough
CT: control target
= control target key end

     0   :  { %s2067_s0 = inlined_call_operand.hbm [shape: f32[256,128], index: 0, kind: input, shape index: {}]   ;;  %s2068_s1 = inlined_call_operand.hbm [shape: f32[128,256], index: 1, kind: input, shape index: {}]   ;;  %s2069_s2 = inlined_call_operand.hbm [shape: f32[256,256], index: 2, kind: input, shape index: {}]   ;;  %s2070_s3 = inlined_call_operand.hbm [shape: f32[256,256], index: 3, kind: output, shape index: {}]  }
   0x1   :  { %2086 = sst [smem:[#allocation19_spill]] %s2068_s1 }
   0x2   :  { %2087 = sst [smem:[#allocation20_spill]] %s2070_s3 }
   0x3   :  { %8 = vsyncpa [#allocation4], 0 }
   0x4   :  { %10 = vsyncpa [#allocation4 + $0x1], 0 }
   0x5   :  { %11 = vsyncpa [#allocation7], 0 }
   0x6   :  { %13 = vsyncpa [#allocation7 + $0x1], 0 }
   0x7   :  { %14 = vsyncpa [#allocation5], 0 }
   0x8   :  { %16 = vsyncpa [#allocation5 + $0x1], 0  ;;  %s1578_s12 = smov 0   ;;  %s1580_s13 = smov 0  }
   0x9   :  { %s1582_s14 = smov 0   ;;  %s1584_s15 = smov 0  }
   0xa   :  { %s1586_s16 = smov 0   ;;  %s1588_s17 = smov 0  }
   0xb   :  { %s1590_s18 = smov 0   ;;  %s1592_s19 = smov 0  }
   0xc   :  { %s1594_s20 = smov 0   ;;  %s1596_s21 = smov 0  }
   0xd   :  { %s1598_s22 = smov 0  }
   0xe LB: > { %2088 = sst [smem:[#allocation13_spill]] %s1524_s17  ;;  %s31_s23 = sadd.s32 1, %s1536_s20  ;;  %s1544_s22 = sphi %s1598_s22, %s22_s22   ;;  %s1540_s21 = sphi %s1596_s21, %s2125_s21   ;;  %s1536_s20 = sphi %s1594_s20, %s2132_s20   ;;  %s1532_s19 = sphi %s1592_s19, %s2123_s19   ;;  %s1528_s18 = sphi %s1590_s18, %s2131_s18   ;;  %s1524_s17 = sphi %s1588_s17, %s2122_s17   ;;  %s1520_s16 = sphi %s1586_s16, %s2130_s16   ;;  %s1516_s15 = sphi %s1584_s15, %s2129_s15   ;;  %s1512_s14 = sphi %s1582_s14, %s2128_s14   ;;  %s1508_s13 = sphi %s1580_s13, %s2127_s13   ;;  %s1504_s12 = sphi %s1578_s12, %s2126_s12  }
   0xf   : > { %2089 = sst [smem:[#allocation14_spill]] %s1540_s21  ;;  %p2072_p0 = scmp.eq.s32.totalorder %s1544_s22, 0 }
  0x10   : > { %p1635_p1 = scmp.ge.s32.totalorder %s31_s23, 2  ;;  %s67_s25 = sadd.s32 1, %s1512_s14 }
  0x11   : > { %p74_p2 = scmp.ne.s32.totalorder %s1512_s14, %s1508_s13  ;;  %p2071_p5 = scmp.lt.s32.totalorder %s1544_s22, 4 }
  0x12   : > { %s2134_s23 = smov (%p1635_p1, %s31_s23), 0  ;;  %s177_s27 = sand.u32 1, %s1544_s22  }
  0x13   : > { %2091 = sst [smem:[#allocation15_spill]] %s2134_s23  ;;  %p76_p4 = por %p74_p2, %p2072_p0 }
  0x14   : > { %s64_s26 = ssub.s32 %s1536_s20, %s2134_s23  ;;  %s2076_s29 = sand.u32 1, %s1512_s14  }
  0x15   : > { %p65_p6 = scmp.eq.s32.totalorder %s64_s26, 0  ;;  %s1016_s30 = sshll.u32 %s2076_s29, 7 }
  0x16   : > { %s1017_s4 = sshll.u32 %s1536_s20, 7  ;;  %s2093_s1 = sld [smem:[#allocation19_spill]] }
  0x17   : > { %s1655_s28 = scalar_select %p65_p6, %s1512_s14, %s67_s25  }
  0x18   : > { %s181_s8 = scalar_lea.vmem [#allocation6], %s1016_s30  ;;  %p1668_p7 = pnand %p2071_p5, %p76_p4 }
  0x19   : > { %2092 = sst [smem:[#allocation16_spill]] %s1655_s28  ;;  %s187_s9 = sshll.u32 %s181_s8, 4  ;;  %s1672_s9 = int_to_ptr.vmem [resolvable:$true] %s187_s9 }
  0x1a   : > { %s1675_s11 = scalar_lea.sflag [#allocation7], %s177_s27  ;;  %p2077_p10 = pneg %p1668_p7 }
  0x1c   : > { %s1664_s7 = scalar_lea.hbm %s2093_s1, %s1017_s4  ;;  %s1333_s4 = scalar_lea.hbm %s2093_s1, 4096 }
  0x1d   : > { %s1328_s25 = scalar_lea.hbm %s1664_s7, 2048  ;;  %p1334_p13 = scmp.lt.u32.totalorder %s1664_s7, %s2093_s1 }
  0x1e   : > { %p1329_p9 = scmp.ne.s32.totalorder %s1664_s7, %s1328_s25  ;;  %p1335_p2 = scmp.lt.u32.totalorder %s1333_s4, %s1328_s25 }
  0x1f   : > { %p1337_p6 = scmp.lt.u32.totalorder %s1328_s25, %s1664_s7 }
  0x20   : > { %p1331_p11 = pnand %p2077_p10, %p1329_p9  ;;  %p1336_p4 = por %p1335_p2, %p1334_p13 }
  0x22   : > { %p1332_p12 = pneg %p1331_p11  ;;  %p1338_p5 = por %p1337_p6, %p1336_p4 }
  0x24   : > { %p1339_p3 = pnand %p1338_p5, %p1332_p12 }
  0x26   : > { %1342 = shalt.err (!%p1339_p3)
}
  0x27   : > { %s1343_s27 = scalar_lea.vmem %s1672_s9, 2048  ;;  %s1546_s8 = smov [#allocation6]  }
  0x28   : > { %p1344_p9 = scmp.ne.s32.totalorder %s1672_s9, %s1343_s27  ;;  %s1348_s26 = sshll.u32 %s1546_s8, 4  ;;  %s1349_s26 = int_to_ptr.vmem [resolvable:$false] %s1348_s26 }
  0x29   : > { %s1350_s30 = scalar_lea.vmem %s1349_s26, 4096  ;;  %p1351_p8 = scmp.lt.s32.totalorder %s1672_s9, %s1349_s26 }
  0x2a   : > { %p1346_p11 = pnand %p1344_p9, %p2077_p10  ;;  %p1352_p13 = scmp.lt.s32.totalorder %s1350_s30, %s1343_s27 }
  0x2c   : > { %p1347_p0 = pneg %p1346_p11  ;;  %p1353_p2 = por %p1352_p13, %p1351_p8 }
  0x2e   : > { %p1354_p4 = pnand %p1353_p2, %p1347_p0 }
  0x30   : > { %1357 = shalt.err (!%p1354_p4)
}
  0x31   : > { %s2073_s25 = smov 256   ;;  %s2074_s4 = smov 128  }
  0x32   : > { %s2075_s5 = smov 8   ;;  %p217_p0 = scmp.lt.s32.totalorder %s1544_s22, 5 }
  0x33   : > { %1222 = dma.hbm_to_vmem [thread:$0]  (!%p1668_p7), %s1664_s7, 2048, %s1672_s9, %s1675_s11, %s2073_s25, %s2074_s4, %s2075_s5  }
  0x34   : > { %p2095_p3 = scmp.ge.s32.totalorder %s1544_s22, 1  ;;  %s1714_s27 = sadd.s32 4294967295, %s1544_s22  }
  0x35   : > { %s1010_s8 = sadd.s32 4294967294, %s1544_s22   ;;  %s34_s26 = sadd.s32 1, %s1540_s21 }
  0x36   : > { %p1709_p5 = pnand %p2095_p3, %p217_p0  ;;  %s41_s30 = sadd.s32 1, %s1524_s17 }
  0x37   : > { %s2136_s26 = smov (!%p1635_p1, %s34_s26), %s1540_s21  ;;  %p48_p8 = scmp.ne.s32.totalorder %s1524_s17, %s1520_s16 }
  0x38   : > { %s2096_s6 = scalar_select %p1709_p5, 1, 0 }
  0x39   : > { %p54_p12 = scmp.ne.s32.totalorder %s1520_s16, %s1516_s15  ;;  %p36_p6 = scmp.ge.s32.totalorder %s2136_s26, 2 }
  0x3a   : > { %p55_p9 = scmp.eq.s32.totalorder %s1714_s27, 0  ;;  %p2097_p11 = scmp.eq.s32.totalorder %s1544_s22, 0 }
  0x3b   : > { %p130_p2 = scmp.eq.s32.totalorder %s1714_s27, 3  ;;  %s2138_s26 = smov (%p36_p6, %s2136_s26), 0 }
  0x3c   : > { %p1729_p13 = por %p2097_p11, %p48_p8  ;;  %2099 = sst [smem:[#allocation17_spill]] %s2138_s26 }
  0x3d   : > { %p1739_p1 = por %p55_p9, %p54_p12  ;;  %p2101_p4 = scmp.ne.s32.totalorder %s1508_s13, %s1504_s12 }
  0x3e   : > { %s38_s25 = ssub.s32 %s1540_s21, %s2138_s26  ;;  %p1752_p3 = por %p130_p2, %p48_p8 }
  0x3f   : > { %s2100_s24 = scalar_select %p1739_p1, 1, 0 }
  0x40   : > { %p1746_p0 = por %p2101_p4, %p55_p9  ;;  %p39_p11 = scmp.eq.s32.totalorder %s38_s25, 0 }
  0x41   : > { %s2103_s4 = scalar_select %p1752_p3, 1, 0 }
  0x42   : > { %s2102_s9 = scalar_select %p1746_p0, 1, 0 }
  0x43   : > { %p136_p6 = scmp.eq.s32.totalorder %s1010_s8, 3  ;;  %s156_s5 = sand.u32 1, %s1524_s17  }
  0x44   : > { %s1035_s29 = sshll.u32 %s1540_s21, 11  ;;  %s1013_s12 = sshll.u32 %s156_s5, 7 }
  0x45   : > { %s1759_s1 = scalar_select %p39_p11, %s1524_s17, %s41_s30  }
  0x46   : > { %p1764_p10 = por %p136_p6, %p54_p12  ;;  %s1771_s26 = scalar_lea.hbm %s2067_s0, %s1035_s29 }
  0x47   : > { %2104 = sst [smem:[#allocation18_spill]] %s1759_s1  ;;  %p2106_p8 = scmp.lt.s32.totalorder %s1544_s22, 4 }
  0x48   : > { %s2105_s23 = scalar_select %p1764_p10, 1, 0 }
  0x49   : > { %p1777_p9 = pnand %p2106_p8, %p1729_p13  ;;  %s160_s8 = scalar_lea.vmem [#allocation3], %s1013_s12 }
  0x4a   : > { %s167_s30 = sshll.u32 %s160_s8, 4  ;;  %s2108_s21 = sand.u32 1, %s1512_s14   ;;  %s1785_s30 = int_to_ptr.vmem [resolvable:$true] %s167_s30 }
  0x4b   : > { %s1783_s1 = sshll.u32 %s2108_s21, 8  ;;  %s1787_s3 = scalar_lea.sflag [#allocation4], %s156_s5 }
  0x4c   : > { %s1358_s28 = scalar_lea.hbm %s1771_s26, 2048  ;;  %p1360_p2 = pneg %p1777_p9 }
  0x4d   : > { %p1359_p12 = scmp.ne.s32.totalorder %s1771_s26, %s1358_s28  ;;  %s1363_s12 = scalar_lea.hbm %s2067_s0, 4096 }
  0x4e   : > { %p1364_p11 = scmp.lt.u32.totalorder %s1771_s26, %s2067_s0  ;;  %p1365_p6 = scmp.lt.u32.totalorder %s1363_s12, %s1358_s28 }
  0x4f   : > { %p1361_p13 = pnand %p1360_p2, %p1359_p12  ;;  %p1367_p10 = scmp.lt.u32.totalorder %s1358_s28, %s1771_s26 }
  0x50   : > { %p1366_p8 = por %p1365_p6, %p1364_p11 }
  0x51   : > { %p1362_p4 = pneg %p1361_p13 }
  0x52   : > { %p1368_p3 = por %p1367_p10, %p1366_p8 }
  0x54   : > { %p1369_p0 = pnand %p1368_p3, %p1362_p4 }
  0x56   : > { %1372 = shalt.err (!%p1369_p0)
}
  0x57   : > { %s1373_s21 = scalar_lea.vmem %s1785_s30, 2048  ;;  %s1550_s5 = smov [#allocation3]  }
  0x58   : > { %p1374_p12 = scmp.ne.s32.totalorder %s1785_s30, %s1373_s21  ;;  %s1378_s29 = sshll.u32 %s1550_s5, 4  ;;  %s1379_s29 = int_to_ptr.vmem [resolvable:$false] %s1378_s29 }
  0x59   : > { %s1380_s17 = scalar_lea.vmem %s1379_s29, 4096  ;;  %p1381_p5 = scmp.lt.s32.totalorder %s1785_s30, %s1379_s29 }
  0x5a   : > { %p1376_p13 = pnand %p1374_p12, %p1360_p2  ;;  %p1382_p11 = scmp.lt.s32.totalorder %s1380_s17, %s1373_s21 }
  0x5c   : > { %p1377_p1 = pneg %p1376_p13  ;;  %p1383_p6 = por %p1382_p11, %p1381_p5 }
  0x5e   : > { %p1384_p10 = pnand %p1383_p6, %p1377_p1 }
  0x60   : > { %1387 = shalt.err (!%p1384_p10)
}
  0x61   : > { %s2109_s28 = smov 8   ;;  %s2110_s7 = smov 128  }
  0x62   : > { %1219 = dma.hbm_to_vmem [thread:$0]  (!%p1777_p9), %s1771_s26, 2048, %s1785_s30, %s1787_s3, %s2110_s7, %s2110_s7, %s2109_s28  }
  0x63   : > { %s1037_s12 = sshll.u32 %s1536_s20, 12  ;;  %s201_s25 = scalar_lea.vmem [#allocation8], %s1783_s1 }
  0x64   : > { %s1822_s21 = scalar_lea.hbm %s2069_s2, %s1037_s12  ;;  %s209_s29 = sshll.u32 %s201_s25, 4  ;;  %s1825_s29 = int_to_ptr.vmem [resolvable:$true] %s209_s29 }
  0x65   : > { %s1388_s17 = scalar_lea.hbm %s1822_s21, 4096  ;;  %p2111_p1 = pneg %p1668_p7 }
  0x66   : > { %p1389_p5 = scmp.ne.s32.totalorder %s1822_s21, %s1388_s17  ;;  %s1393_s3 = scalar_lea.hbm %s2069_s2, 8192 }
  0x67   : > { %p1394_p9 = scmp.lt.u32.totalorder %s1822_s21, %s2069_s2  ;;  %p1395_p2 = scmp.lt.u32.totalorder %s1393_s3, %s1388_s17 }
  0x68   : > { %p1391_p0 = pnand %p1389_p5, %p2111_p1  ;;  %p1397_p8 = scmp.lt.u32.totalorder %s1388_s17, %s1822_s21 }
  0x69   : > { %p1396_p4 = por %p1395_p2, %p1394_p9 }
  0x6a   : > { %p1392_p3 = pneg %p1391_p0 }
  0x6b   : > { %p1398_p12 = por %p1397_p8, %p1396_p4 }
  0x6d   : > { %p1399_p13 = pnand %p1398_p12, %p1392_p3 }
  0x6f   : > { %1402 = shalt.err (!%p1399_p13)
}
  0x70   : > { %s1403_s1 = scalar_lea.vmem %s1825_s29, 4096  ;;  %p2112_p6 = pmov %p2111_p1 }
  0x71   : > { %p1404_p11 = scmp.ne.s32.totalorder %s1825_s29, %s1403_s1  ;;  %s1551_s12 = smov [#allocation8]  }
  0x72   : > { %s1408_s8 = sshll.u32 %s1551_s12, 4  ;;  %s1409_s8 = int_to_ptr.vmem [resolvable:$false] %s1408_s8 }
  0x73   : > { %p1406_p10 = pnand %p1404_p11, %p2112_p6  ;;  %s1410_s5 = scalar_lea.vmem %s1409_s8, 8192 }
  0x74   : > { %p1411_p1 = scmp.lt.s32.totalorder %s1825_s29, %s1409_s8  ;;  %p1412_p0 = scmp.lt.s32.totalorder %s1410_s5, %s1403_s1 }
  0x75   : > { %p1407_p5 = pneg %p1406_p10 }
  0x76   : > { %p1413_p9 = por %p1412_p0, %p1411_p1 }
  0x78   : > { %p1414_p2 = pnand %p1413_p9, %p1407_p5 }
  0x7a   : > { %1417 = shalt.err (!%p1414_p2)
}
  0x7b   : > { %s1552_s25 = smov 16   ;;  %s2113_s17 = smov 256  }
  0x7c   : > { %1225 = dma.hbm_to_vmem [thread:$0]  (!%p1668_p7), %s1822_s21, 4096, %s1825_s29, %s1675_s11, %s2113_s17, %s2113_s17, %s1552_s25  }
  0x7d   : > { %p2114_p3 = scmp.ne.s32.totalorder %s2096_s6, 0 }
  0x7e   : > { %s1856_s26 = sand.u32 (!%p2114_p3), 1, %s1520_s16   ;;  %p2115_p4 = scmp.ne.s32.totalorder (!%p2114_p3), %s2100_s24, 0 }
  0x7f   : > { %221 = sbr.rel (%p2114_p3) target bundleno = 713 (0x2c9), region = 32  ;;  %s1023_s30 = sshll.u32 (!%p2114_p3), %s1856_s26, 7 }
  0x80   : > { %s224_s3 = scalar_lea.sflag (!%p2114_p3), [#allocation4], %s1856_s26  ;;  %s1860_s28 = scalar_lea.vmem (!%p2114_p3), [#allocation3], %s1023_s30 }
  0x86   : > { %1491 = dma.done.wait (%p2115_p4), %s224_s3, 2048  }
  0x87   : > { %1493 = vsyncadd (%p2115_p4), %s224_s3, 4294965248  ;;  %s232_s10 = sand.u32 1, %s1714_s27   ;;  %s234_s11 = sand.u32 1, %s1508_s13  }
  0x88   : > { %s1024_s6 = sshll.u32 %s234_s11, 7  ;;  %s233_s21 = scalar_lea.sflag [#allocation7], %s232_s10 }
  0x89   : > { %s1868_s29 = scalar_lea.vmem [#allocation6], %s1024_s6  ;;  %p2116_p7 = scmp.ne.s32.totalorder %s2102_s9, 0 }
  0x8b   : > { %1495 = dma.done.wait (%p2116_p7), %s233_s21, 6144  }
  0x8c   : > { %1497 = vsyncadd (%p2116_p7), %s233_s21, 4294961152  ;;  %s1025_s7 = sshll.u32 %s234_s11, 8  ;;  %s1026_s1 = sshll.u32 %s1856_s26, 8 }
  0x8d   : > { %s1875_s12 = scalar_lea.vmem [#allocation8], %s1025_s7  ;;  %s1877_s24 = scalar_lea.vmem [#allocation9], %s1026_s1 }
  0x8e   : > { %p1027_p8 = scmp.ne.s32.totalorder %s1528_s18, 0 }
  0x8f   : > { %v1553_v0 = vmov (!%p1027_p8), 0.0  }
  0x90   : > { %284 = sbr.rel (%p1027_p8) target bundleno = 160 (0xa0), region = 48  ;;  %285 = vst [vmem:[#allocation2] sm:$0xff] (!%p1027_p8), %v1553_v0  ;;  %286 = vst [vmem:[#allocation2 + $0x8] sm:$0xff] (!%p1027_p8), %v1553_v0 }
  0x91   : > { %287 = vst [vmem:[#allocation2 + $0x10] sm:$0xff] (!%p1027_p8), %v1553_v0  ;;  %288 = vst [vmem:[#allocation2 + $0x18] sm:$0xff] (!%p1027_p8), %v1553_v0 }
  0x92   : > { %289 = vst [vmem:[#allocation2 + $0x20] sm:$0xff] (!%p1027_p8), %v1553_v0  ;;  %290 = vst [vmem:[#allocation2 + $0x28] sm:$0xff] (!%p1027_p8), %v1553_v0 }
  0x93   : > { %291 = vst [vmem:[#allocation2 + $0x30] sm:$0xff] (!%p1027_p8), %v1553_v0  ;;  %292 = vst [vmem:[#allocation2 + $0x38] sm:$0xff] (!%p1027_p8), %v1553_v0 }
  0x94   : > { %293 = vst [vmem:[#allocation2 + $0x40] sm:$0xff] (!%p1027_p8), %v1553_v0  ;;  %294 = vst [vmem:[#allocation2 + $0x48] sm:$0xff] (!%p1027_p8), %v1553_v0 }
  0x95   : > { %295 = vst [vmem:[#allocation2 + $0x50] sm:$0xff] (!%p1027_p8), %v1553_v0  ;;  %296 = vst [vmem:[#allocation2 + $0x58] sm:$0xff] (!%p1027_p8), %v1553_v0 }
  0x96   : > { %297 = vst [vmem:[#allocation2 + $0x60] sm:$0xff] (!%p1027_p8), %v1553_v0  ;;  %298 = vst [vmem:[#allocation2 + $0x68] sm:$0xff] (!%p1027_p8), %v1553_v0 }
  0x97   : > { %299 = vst [vmem:[#allocation2 + $0x70] sm:$0xff] %v1553_v0  ;;  %300 = vst [vmem:[#allocation2 + $0x78] sm:$0xff] %v1553_v0 }
  0x98   : > { %301 = vst [vmem:[#allocation2 + $0x80] sm:$0xff] %v1553_v0  ;;  %302 = vst [vmem:[#allocation2 + $0x88] sm:$0xff] %v1553_v0 }
  0x99   : > { %303 = vst [vmem:[#allocation2 + $0x90] sm:$0xff] %v1553_v0  ;;  %304 = vst [vmem:[#allocation2 + $0x98] sm:$0xff] %v1553_v0 }
  0x9a   : > { %305 = vst [vmem:[#allocation2 + $0xa0] sm:$0xff] %v1553_v0  ;;  %306 = vst [vmem:[#allocation2 + $0xa8] sm:$0xff] %v1553_v0 }
  0x9b   : > { %307 = vst [vmem:[#allocation2 + $0xb0] sm:$0xff] %v1553_v0  ;;  %308 = vst [vmem:[#allocation2 + $0xb8] sm:$0xff] %v1553_v0 }
  0x9c   : > { %309 = vst [vmem:[#allocation2 + $0xc0] sm:$0xff] %v1553_v0  ;;  %310 = vst [vmem:[#allocation2 + $0xc8] sm:$0xff] %v1553_v0 }
  0x9d   : > { %311 = vst [vmem:[#allocation2 + $0xd0] sm:$0xff] %v1553_v0  ;;  %312 = vst [vmem:[#allocation2 + $0xd8] sm:$0xff] %v1553_v0 }
  0x9e   : > { %313 = vst [vmem:[#allocation2 + $0xe0] sm:$0xff] %v1553_v0  ;;  %314 = vst [vmem:[#allocation2 + $0xe8] sm:$0xff] %v1553_v0 }
  0x9f   : > { %315 = vst [vmem:[#allocation2 + $0xf0] sm:$0xff] %v1553_v0  ;;  %316 = vst [vmem:[#allocation2 + $0xf8] sm:$0xff] %v1553_v0 }
  0xa0 PF: > { %v333_v1 = vld [vmem:[%s1868_s29] sm:$0xff]  ;;  %v334_v2 = vld [vmem:[%s1868_s29 + $0x8] sm:$0xff]  ;;  %v335_v3 = vld [vmem:[%s1868_s29 + $0x10] sm:$0xff]  ;;  %p1028_p12 = scmp.ne.s32.totalorder %s1528_s18, 1 }
  0xa1   : > { %v1128_v4 = vpack.c.bf16 %v334_v2, %v333_v1  ;;  %v336_v5 = vld [vmem:[%s1868_s29 + $0x18] sm:$0xff]  ;;  %v337_v7 = vld [vmem:[%s1868_s29 + $0x20] sm:$0xff]  ;;  %v338_v8 = vld [vmem:[%s1868_s29 + $0x28] sm:$0xff] }
  0xa2   : > { %v1132_v6 = vpack.c.bf16 %v336_v5, %v335_v3  ;;  %v1136_v9 = vpack.c.bf16 %v338_v8, %v337_v7  ;;  %v317_v10 = vld [vmem:[%s1860_s28] sm:$0xff]  ;;  %v339_v11 = vld [vmem:[%s1868_s29 + $0x30] sm:$0xff]  ;;  %v340_v12 = vld [vmem:[%s1868_s29 + $0x38] sm:$0xff] }
  0xa3   : > { %1129 = vmatprep.subr.bf16.mxu0 %v1128_v4  ;;  %1104 = vmatprep.mubr.f32.mxu0 %v317_v10  ;;  %v1140_v13 = vpack.c.bf16 %v340_v12, %v339_v11  ;;  %v341_v14 = vld [vmem:[%s1868_s29 + $0x40] sm:$0xff]  ;;  %v342_v15 = vld [vmem:[%s1868_s29 + $0x48] sm:$0xff]  ;;  %v545_v17 = vld [vmem:[%s1875_s12 + $0x18] sm:$0xff] }
  0xa4   : > { %1131 = vmatpush3.bf16.msra.mxu0 %v1128_v4  ;;  %v543_v16 = vld [vmem:[%s1875_s12 + $0x8] sm:$0xff]  ;;  %v542_v18 = vld [vmem:[%s1875_s12] sm:$0xff]  ;;  %v544_v19 = vld [vmem:[%s1875_s12 + $0x10] sm:$0xff]  ;;  %v1144_v23 = vpack.c.bf16 %v342_v15, %v341_v14 }
  0xa5   : > { %1133 = vmatprep.subr.bf16.mxu0 %v1132_v6  ;;  %v1895_v20 = vpack.c.bf16 %v545_v17, %v543_v16  ;;  %v547_v21 = vld [vmem:[%s1875_s12 + $0x28] sm:$0xff]  ;;  %v549_v22 = vld [vmem:[%s1875_s12 + $0x38] sm:$0xff]  ;;  %v343_v24 = vld [vmem:[%s1868_s29 + $0x50] sm:$0xff]  ;;  %v1900_v25 = vpack.c.bf16 %v544_v19, %v542_v18 }
  0xa6   : > { %v344_v26 = vld [vmem:[%s1868_s29 + $0x58] sm:$0xff]  ;;  %v1903_v27 = vpack.c.bf16 %v549_v22, %v547_v21  ;;  %v546_v28 = vld [vmem:[%s1875_s12 + $0x20] sm:$0xff]  ;;  %v548_v29 = vld [vmem:[%s1875_s12 + $0x30] sm:$0xff] }
  0xa7   : > { %1192 = vmatprep.subr.bf16.mxu1 %v1895_v20  ;;  %v551_v30 = vld [vmem:[%s1875_s12 + $0x48] sm:$0xff]  ;;  %v553_v31 = vld [vmem:[%s1875_s12 + $0x58] sm:$0xff]  ;;  %v1148_v32 = vpack.c.bf16 %v344_v26, %v343_v24  ;;  %v345_v33 = vld [vmem:[%s1868_s29 + $0x60] sm:$0xff]  ;;  %v1913_v34 = vpack.c.bf16 %v548_v29, %v546_v28 }
  0xa8   : > { %1135 = vmatpush3.bf16.msra.mxu0 %v1132_v6  ;;  %1200 = vmatpush1.bf16.msra.mxu1 %v1900_v25  ;;  %v346_v35 = vld [vmem:[%s1868_s29 + $0x68] sm:$0xff]  ;;  %v1916_v36 = vpack.c.bf16 %v553_v31, %v551_v30  ;;  %v550_v37 = vld [vmem:[%s1875_s12 + $0x40] sm:$0xff]  ;;  %v552_v38 = vld [vmem:[%s1875_s12 + $0x50] sm:$0xff] }
  0xa9   : > { %1137 = vmatprep.subr.bf16.mxu0 %v1136_v9  ;;  %1193 = vmatprep.subr.bf16.mxu1 %v1903_v27  ;;  %v555_v39 = vld [vmem:[%s1875_s12 + $0x68] sm:$0xff]  ;;  %v557_v40 = vld [vmem:[%s1875_s12 + $0x78] sm:$0xff]  ;;  %v1152_v41 = vpack.c.bf16 %v346_v35, %v345_v33  ;;  %v347_v42 = vld [vmem:[%s1868_s29 + $0x70] sm:$0xff]  ;;  %v1170_v43 = vpack.c.bf16 %v552_v38, %v550_v37 }
  0xaa   : > { %v348_v44 = vld [vmem:[%s1868_s29 + $0x78] sm:$0xff]  ;;  %v1172_v45 = vpack.c.bf16 %v557_v40, %v555_v39  ;;  %v554_v46 = vld [vmem:[%s1875_s12 + $0x60] sm:$0xff]  ;;  %v556_v47 = vld [vmem:[%s1875_s12 + $0x70] sm:$0xff] }
  0xab   : > { %v559_v48 = vld [vmem:[%s1875_s12 + $0x88] sm:$0xff]  ;;  %v561_v49 = vld [vmem:[%s1875_s12 + $0x98] sm:$0xff]  ;;  %v1156_v50 = vpack.c.bf16 %v348_v44, %v347_v42  ;;  %v1174_v51 = vpack.c.bf16 %v556_v47, %v554_v46  ;;  %v558_v53 = vld [vmem:[%s1875_s12 + $0x80] sm:$0xff] }
  0xac   : > { %1139 = vmatpush3.bf16.msra.mxu0 %v1136_v9  ;;  %1201 = vmatpush1.bf16.msra.mxu1 %v1913_v34  ;;  %v1176_v52 = vpack.c.bf16 %v561_v49, %v559_v48  ;;  %v560_v54 = vld [vmem:[%s1875_s12 + $0x90] sm:$0xff]  ;;  %v563_v55 = vld [vmem:[%s1875_s12 + $0xa8] sm:$0xff]  ;;  %v565_v56 = vld [vmem:[%s1875_s12 + $0xb8] sm:$0xff] }
  0xad   : > { %1141 = vmatprep.subr.bf16.mxu0 %v1140_v13  ;;  %1194 = vmatprep.subr.bf16.mxu1 %v1916_v36  ;;  %v1178_v57 = vpack.c.bf16 %v560_v54, %v558_v53  ;;  %v1180_v58 = vpack.c.bf16 %v565_v56, %v563_v55  ;;  %v562_v59 = vld [vmem:[%s1875_s12 + $0xa0] sm:$0xff]  ;;  %v564_v60 = vld [vmem:[%s1875_s12 + $0xb0] sm:$0xff]  ;;  %v318_v61 = vld [vmem:[%s1860_s28 + $0x8] sm:$0xff] }
  0xae   : > { %v567_v62 = vld [vmem:[%s1875_s12 + $0xc8] sm:$0xff]  ;;  %v569_v63 = vld [vmem:[%s1875_s12 + $0xd8] sm:$0xff]  ;;  %v319_v0 = vld [vmem:[%s1860_s28 + $0x10] sm:$0xff]  ;;  %v1182_v1 = vpack.c.bf16 %v564_v60, %v562_v59 }
  0xaf   : > { %v566_v2 = vld [vmem:[%s1875_s12 + $0xc0] sm:$0xff]  ;;  %v568_v3 = vld [vmem:[%s1875_s12 + $0xd0] sm:$0xff]  ;;  %v1184_v4 = vpack.c.bf16 %v569_v63, %v567_v62  ;;  %v320_v5 = vld [vmem:[%s1860_s28 + $0x18] sm:$0xff] }
  0xb0   : > { %1143 = vmatpush3.bf16.msra.mxu0 %v1140_v13  ;;  %1202 = vmatpush1.bf16.msra.mxu1 %v1170_v43  ;;  %v321_v6 = vld [vmem:[%s1860_s28 + $0x20] sm:$0xff]  ;;  %v1186_v7 = vpack.c.bf16 %v568_v3, %v566_v2  ;;  %v322_v8 = vld [vmem:[%s1860_s28 + $0x28] sm:$0xff]  ;;  %v323_v9 = vld [vmem:[%s1860_s28 + $0x30] sm:$0xff] }
  0xb1   : > { %1145 = vmatprep.subr.bf16.mxu0 %v1144_v23  ;;  %1195 = vmatprep.subr.bf16.mxu1 %v1172_v45  ;;  %v324_v10 = vld [vmem:[%s1860_s28 + $0x38] sm:$0xff]  ;;  %v325_v11 = vld [vmem:[%s1860_s28 + $0x40] sm:$0xff]  ;;  %v326_v12 = vld [vmem:[%s1860_s28 + $0x48] sm:$0xff] }
  0xb2   : > { %v327_v13 = vld [vmem:[%s1860_s28 + $0x50] sm:$0xff]  ;;  %v328_v14 = vld [vmem:[%s1860_s28 + $0x58] sm:$0xff]  ;;  %v329_v15 = vld [vmem:[%s1860_s28 + $0x60] sm:$0xff] }
  0xb3   : > { %v330_v16 = vld [vmem:[%s1860_s28 + $0x68] sm:$0xff]  ;;  %v331_v17 = vld [vmem:[%s1860_s28 + $0x70] sm:$0xff]  ;;  %v332_v18 = vld [vmem:[%s1860_s28 + $0x78] sm:$0xff] }
  0xb4   : > { %1147 = vmatpush3.bf16.msra.mxu0 %v1144_v23  ;;  %1203 = vmatpush1.bf16.msra.mxu1 %v1174_v51  ;;  %v571_v19 = vld [vmem:[%s1875_s12 + $0xe8] sm:$0xff]  ;;  %v570_v22 = vld [vmem:[%s1875_s12 + $0xe0] sm:$0xff]  ;;  %v572_v23 = vld [vmem:[%s1875_s12 + $0xf0] sm:$0xff] }
  0xb5   : > { %1149 = vmatprep.subr.bf16.mxu0 %v1148_v32  ;;  %1196 = vmatprep.subr.bf16.mxu1 %v1176_v52  ;;  %v1190_v24 = vpack.c.bf16 %v572_v23, %v570_v22  ;;  %v511_v59 = vld [vmem:[#allocation2 + $0x8] sm:$0xff] }
  0xb8   : > { %1151 = vmatpush3.bf16.msra.mxu0 %v1148_v32  ;;  %1204 = vmatpush1.bf16.msra.mxu1 %v1178_v57 }
  0xb9   : > { %1153 = vmatprep.subr.bf16.mxu0 %v1152_v41  ;;  %1197 = vmatprep.subr.bf16.mxu1 %v1180_v58 }
  0xbc   : > { %1155 = vmatpush3.bf16.msra.mxu0 %v1152_v41  ;;  %1205 = vmatpush1.bf16.msra.mxu1 %v1182_v1 }
  0xbd   : > { %1157 = vmatprep.subr.bf16.mxu0 %v1156_v50  ;;  %1198 = vmatprep.subr.bf16.mxu1 %v1184_v4 }
  0xc0   : > { %1159 = vmatpush3.bf16.msra.mxu0 %v1156_v50  ;;  %1206 = vmatpush1.bf16.msra.mxu1 %v1186_v7 }
  0xc1   : > { %1161 = vmatprep.subr.bf16.mxu0 %v1895_v20  ;;  %v573_v20 = vld [vmem:[%s1875_s12 + $0xf8] sm:$0xff] }
  0xc2   : > { %v1188_v21 = vpack.c.bf16 %v573_v20, %v571_v19  ;;  %v520_v19 = vld [vmem:[#allocation2 + $0x50] sm:$0xff]  ;;  %v517_v20 = vld [vmem:[#allocation2 + $0x38] sm:$0xff] }
  0xc3   : > { %1105 = vmatmul.mubr.f32.vlgmr.msra.gmra.mrb[0].mxu0 %v318_v61 }
  0xc4   : > { %1107 = vmatprep.mubr.f32.mxu0 %v319_v0  ;;  %1163 = vmatpush1.bf16.msra.mxu0 %v1900_v25  ;;  %v1554_v25 = vmov 0.0   ;;  %v512_v0 = vld [vmem:[#allocation2 + $0x10] sm:$0xff] }
  0xc5   : > { %1165 = vmatprep.subr.bf16.mxu0 %v1903_v27  ;;  %1199 = vmatprep.subr.bf16.mxu1 %v1188_v21 }
  0xc6   : > { %1207 = vmatpush1.bf16.msra.mxu1 %v1190_v24  ;;  %662 = vmatprep.mubr.f32.mxu1 %v1554_v25 }
  0xc7   : > { %1108 = vmatmul.mubr.f32.gmra.mrb[2].mxu0 %v320_v5 }
  0xc8   : > { %1110 = vmatprep.mubr.f32.mxu0 %v321_v6  ;;  %1167 = vmatpush1.bf16.msra.mxu0 %v1913_v34  ;;  %v514_v6 = vld [vmem:[#allocation2 + $0x20] sm:$0xff] }
  0xc9   : > { %1169 = vmatprep.subr.bf16.mxu0 %v1916_v36 }
  0xcb   : > { %1111 = vmatmul.mubr.f32.gmra.mrb[4].mxu0 %v322_v8  ;;  %v515_v8 = vld [vmem:[#allocation2 + $0x28] sm:$0xff] }
  0xcc   : > { %1113 = vmatprep.mubr.f32.mxu0 %v323_v9  ;;  %1171 = vmatpush1.bf16.msra.mxu0 %v1170_v43  ;;  %v519_v9 = vld [vmem:[#allocation2 + $0x48] sm:$0xff] }
  0xcd   : > { %1173 = vmatprep.subr.bf16.mxu0 %v1172_v45 }
  0xcf   : > { %1114 = vmatmul.mubr.f32.gmra.mrb[6].mxu0 %v324_v10 }
  0xd0   : > { %1116 = vmatprep.mubr.f32.mxu0 %v325_v11  ;;  %1175 = vmatpush1.bf16.msra.mxu0 %v1174_v51 }
  0xd1   : > { %1177 = vmatprep.subr.bf16.mxu0 %v1176_v52 }
  0xd3   : > { %1117 = vmatmul.mubr.f32.gmra.mrb[8].mxu0 %v326_v12 }
  0xd4   : > { %1119 = vmatprep.mubr.f32.mxu0 %v327_v13  ;;  %1179 = vmatpush1.bf16.msra.mxu0 %v1178_v57 }
  0xd5   : > { %1181 = vmatprep.subr.bf16.mxu0 %v1180_v58  ;;  %v510_v58 = vld [vmem:[#allocation2] sm:$0xff] }
  0xd7   : > { %1120 = vmatmul.mubr.f32.gmra.mrb[10].mxu0 %v328_v14 }
  0xd8   : > { %1122 = vmatprep.mubr.f32.mxu0 %v329_v15  ;;  %1183 = vmatpush1.bf16.msra.mxu0 %v1182_v1  ;;  %v513_v1 = vld [vmem:[#allocation2 + $0x18] sm:$0xff] }
  0xd9   : > { %1185 = vmatprep.subr.bf16.mxu0 %v1184_v4 }
  0xdb   : > { %1123 = vmatmul.mubr.f32.gmra.mrb[12].mxu0 %v330_v16 }
  0xdc   : > { %1125 = vmatprep.mubr.f32.mxu0 %v331_v17  ;;  %1187 = vmatpush1.bf16.msra.mxu0 %v1186_v7  ;;  %v518_v7 = vld [vmem:[#allocation2 + $0x40] sm:$0xff] }
  0xdd   : > { %1189 = vmatprep.subr.bf16.mxu0 %v1188_v21  ;;  %v521_v21 = vld [vmem:[#allocation2 + $0x58] sm:$0xff] }
  0xdf   : > { %1126 = vmatmul.mubr.f32.gmra.mrb[14].mxu0 %v332_v18  ;;  %v516_v18 = vld [vmem:[#allocation2 + $0x30] sm:$0xff] }
  0xe0   : > { %1191 = vmatpush1.bf16.msra.mxu0 %v1190_v24  ;;  %638 = vmatprep.mubr.f32.mxu0 %v1554_v25 }
 0x196   : > { %v1106_v26 = vpop.f32.mrb[0].mxu0 }
 0x197   : > { %v415_v27 = vpop.f32.mrb[1].mxu0  ;;  %v495_v31 = vmax.f32 %v1106_v26, 0.0 }
 0x198   : > { %v494_v28 = vmax.f32 %v415_v27, 0.0 }
 0x19a   : > { %v1109_v29 = vpop.f32.mrb[2].mxu0  ;;  %639 = vmatmul.mubr.f32.vlgmr.msra.gmra.mrb[16].mxu0 %v494_v28 }
 0x19b   : > { %v425_v30 = vpop.f32.mrb[3].mxu0  ;;  %644 = vmatprep.mubr.f32.mxu0 %v1554_v25  ;;  %v497_v38 = vmax.f32 %v1109_v29, 0.0 }
 0x19c   : > { %v496_v34 = vmax.f32 %v425_v30, 0.0  ;;  %v522_v30 = vld [vmem:[#allocation2 + $0x60] sm:$0xff] }
 0x19e   : > { %v1112_v32 = vpop.f32.mrb[4].mxu0  ;;  %645 = vmatmul.mubr.f32.gmra.mrb[18].mxu0 %v495_v31  ;;  %v523_v31 = vld [vmem:[#allocation2 + $0x68] sm:$0xff] }
 0x19f   : > { %v435_v33 = vpop.f32.mrb[5].mxu0  ;;  %650 = vmatprep.mubr.f32.mxu0 %v1554_v25  ;;  %v499_v39 = vmax.f32 %v1112_v32, 0.0 }
 0x1a0   : > { %v498_v35 = vmax.f32 %v435_v33, 0.0 }
 0x1a2   : > { %651 = vmatmul.mubr.f32.gmra.mrb[20].mxu0 %v496_v34  ;;  %663 = vmatmul.mubr.f32.vlgmr.msra.gmra.mrb[0].mxu1 %v498_v35  ;;  %v1115_v36 = vpop.f32.mrb[6].mxu0 }
 0x1a3   : > { %656 = vmatprep.mubr.f32.mxu0 %v1554_v25  ;;  %668 = vmatprep.mubr.f32.mxu1 %v1554_v25  ;;  %v445_v37 = vpop.f32.mrb[7].mxu0  ;;  %v501_v45 = vmax.f32 %v1115_v36, 0.0  ;;  %v524_v36 = vld [vmem:[#allocation2 + $0x70] sm:$0xff] }
 0x1a4   : > { %v500_v40 = vmax.f32 %v445_v37, 0.0  ;;  %v525_v37 = vld [vmem:[#allocation2 + $0x78] sm:$0xff] }
 0x1a6   : > { %657 = vmatmul.mubr.f32.gmra.mrb[22].mxu0 %v497_v38  ;;  %669 = vmatmul.mubr.f32.gmra.mrb[2].mxu1 %v499_v39  ;;  %v1118_v41 = vpop.f32.mrb[8].mxu0 }
 0x1a7   : > { %674 = vmatprep.mubr.f32.mxu1 %v1554_v25  ;;  %v455_v42 = vpop.f32.mrb[9].mxu0  ;;  %v503_v51 = vmax.f32 %v1118_v41, 0.0 }
 0x1a8   : > { %v502_v46 = vmax.f32 %v455_v42, 0.0  ;;  %v526_v42 = vld [vmem:[#allocation2 + $0x80] sm:$0xff] }
 0x1aa   : > { %675 = vmatmul.mubr.f32.gmra.mrb[4].mxu1 %v500_v40  ;;  %v1121_v43 = vpop.f32.mrb[10].mxu0 }
 0x1ab   : > { %680 = vmatprep.mubr.f32.mxu1 %v1554_v25  ;;  %v465_v44 = vpop.f32.mrb[11].mxu0  ;;  %v505_v53 = vmax.f32 %v1121_v43, 0.0  ;;  %v527_v43 = vld [vmem:[#allocation2 + $0x88] sm:$0xff] }
 0x1ac   : > { %v504_v52 = vmax.f32 %v465_v44, 0.0 }
 0x1ae   : > { %681 = vmatmul.mubr.f32.gmra.mrb[6].mxu1 %v501_v45  ;;  %v1124_v47 = vpop.f32.mrb[12].mxu0 }
 0x1af   : > { %686 = vmatprep.mubr.f32.mxu1 %v1554_v25  ;;  %v475_v48 = vpop.f32.mrb[13].mxu0  ;;  %v507_v55 = vmax.f32 %v1124_v47, 0.0 }
 0x1b0   : > { %v506_v54 = vmax.f32 %v475_v48, 0.0  ;;  %v528_v48 = vld [vmem:[#allocation2 + $0x90] sm:$0xff] }
 0x1b2   : > { %687 = vmatmul.mubr.f32.gmra.mrb[8].mxu1 %v502_v46  ;;  %v1127_v49 = vpop.f32.mrb[14].mxu0 }
 0x1b3   : > { %692 = vmatprep.mubr.f32.mxu1 %v1554_v25  ;;  %v485_v50 = vpop.f32.mrb[15].mxu0  ;;  %v509_v57 = vmax.f32 %v1127_v49, 0.0  ;;  %v529_v49 = vld [vmem:[#allocation2 + $0x98] sm:$0xff] }
 0x1b4   : > { %v508_v56 = vmax.f32 %v485_v50, 0.0 }
 0x1b6   : > { %693 = vmatmul.mubr.f32.gmra.mrb[10].mxu1 %v503_v51 }
 0x1b7   : > { %698 = vmatprep.mubr.f32.mxu1 %v1554_v25 }
 0x1ba   : > { %699 = vmatmul.mubr.f32.gmra.mrb[12].mxu1 %v504_v52 }
 0x1bb   : > { %704 = vmatprep.mubr.f32.mxu1 %v1554_v25 }
 0x1be   : > { %705 = vmatmul.mubr.f32.gmra.mrb[14].mxu1 %v505_v53 }
 0x1bf   : > { %710 = vmatprep.mubr.f32.mxu1 %v1554_v25 }
 0x1c2   : > { %711 = vmatmul.mubr.f32.gmra.mrb[16].mxu1 %v506_v54  ;;  %v530_v54 = vld [vmem:[#allocation2 + $0xa0] sm:$0xff] }
 0x1c3   : > { %716 = vmatprep.mubr.f32.mxu1 %v1554_v25 }
 0x1c6   : > { %717 = vmatmul.mubr.f32.gmra.mrb[18].mxu1 %v507_v55  ;;  %v531_v55 = vld [vmem:[#allocation2 + $0xa8] sm:$0xff] }
 0x1c7   : > { %722 = vmatprep.mubr.f32.mxu1 %v1554_v25 }
 0x1ca   : > { %723 = vmatmul.mubr.f32.gmra.mrb[20].mxu1 %v508_v56 }
 0x1cb   : > { %728 = vmatprep.mubr.f32.mxu1 %v1554_v25 }
 0x1ce   : > { %729 = vmatmul.mubr.f32.gmra.mrb[22].mxu1 %v509_v57 }
 0x26d   : > { %v640_v60 = vpop.f32.mrb[16].mxu0 }
 0x26e   : > { %v735_v61 = vadd.f32 %v640_v60, %v510_v58  ;;  %v642_v62 = vpop.f32.mrb[17].mxu0  ;;  %v532_v60 = vld [vmem:[#allocation2 + $0xb0] sm:$0xff] }
 0x26f   : > { %v736_v63 = vadd.f32 %v642_v62, %v511_v59 }
 0x270   : > { %767 = vst [vmem:[#allocation2] sm:$0xff] %v735_v61  ;;  %v533_v61 = vld [vmem:[#allocation2 + $0xb8] sm:$0xff] }
 0x271   : > { %768 = vst [vmem:[#allocation2 + $0x8] sm:$0xff] %v736_v63  ;;  %v646_v2 = vpop.f32.mrb[18].mxu0 }
 0x272   : > { %v737_v3 = vadd.f32 %v646_v2, %v512_v0  ;;  %v648_v4 = vpop.f32.mrb[19].mxu0  ;;  %v534_v2 = vld [vmem:[#allocation2 + $0xc0] sm:$0xff] }
 0x273   : > { %v738_v5 = vadd.f32 %v648_v4, %v513_v1 }
 0x274   : > { %769 = vst [vmem:[#allocation2 + $0x10] sm:$0xff] %v737_v3  ;;  %v535_v3 = vld [vmem:[#allocation2 + $0xc8] sm:$0xff] }
 0x275   : > { %770 = vst [vmem:[#allocation2 + $0x18] sm:$0xff] %v738_v5  ;;  %v652_v10 = vpop.f32.mrb[20].mxu0  ;;  %v664_v11 = vpop.f32.mrb[0].mxu1 }
 0x276   : > { %v739_v12 = vadd.f32 %v652_v10, %v514_v6  ;;  %v743_v13 = vadd.f32 %v664_v11, %v518_v7  ;;  %v654_v14 = vpop.f32.mrb[21].mxu0  ;;  %v666_v15 = vpop.f32.mrb[1].mxu1 }
 0x277   : > { %v740_v16 = vadd.f32 %v654_v14, %v515_v8  ;;  %v744_v17 = vadd.f32 %v666_v15, %v519_v9  ;;  %v536_v8 = vld [vmem:[#allocation2 + $0xd0] sm:$0xff]  ;;  %v537_v9 = vld [vmem:[#allocation2 + $0xd8] sm:$0xff]  ;;  %v538_v14 = vld [vmem:[#allocation2 + $0xe0] sm:$0xff] }
 0x278   : > { %771 = vst [vmem:[#allocation2 + $0x20] sm:$0xff] %v739_v12  ;;  %775 = vst [vmem:[#allocation2 + $0x40] sm:$0xff] %v743_v13  ;;  %v539_v15 = vld [vmem:[#allocation2 + $0xe8] sm:$0xff] }
 0x279   : > { %772 = vst [vmem:[#allocation2 + $0x28] sm:$0xff] %v740_v16  ;;  %776 = vst [vmem:[#allocation2 + $0x48] sm:$0xff] %v744_v17  ;;  %v658_v22 = vpop.f32.mrb[22].mxu0  ;;  %v670_v23 = vpop.f32.mrb[2].mxu1 }
 0x27a   : > { %v741_v24 = vadd.f32 %v658_v22, %v516_v18  ;;  %v745_v25 = vadd.f32 %v670_v23, %v520_v19  ;;  %v660_v26 = vpop.f32.mrb[23].mxu0  ;;  %v672_v27 = vpop.f32.mrb[3].mxu1 }
 0x27b   : > { %v742_v28 = vadd.f32 %v660_v26, %v517_v20  ;;  %v746_v29 = vadd.f32 %v672_v27, %v521_v21  ;;  %v540_v20 = vld [vmem:[#allocation2 + $0xf0] sm:$0xff]  ;;  %v541_v21 = vld [vmem:[#allocation2 + $0xf8] sm:$0xff]  ;;  %v803_v26 = vld [vmem:[#allocation2] sm:$0xff] (!%p1028_p12) }
 0x27c   : > { %773 = vst [vmem:[#allocation2 + $0x30] sm:$0xff] %v741_v24  ;;  %777 = vst [vmem:[#allocation2 + $0x50] sm:$0xff] %v745_v25  ;;  %v804_v27 = vld [vmem:[#allocation2 + $0x8] sm:$0xff] (!%p1028_p12) }
 0x27d   : > { %774 = vst [vmem:[#allocation2 + $0x38] sm:$0xff] %v742_v28  ;;  %778 = vst [vmem:[#allocation2 + $0x58] sm:$0xff] %v746_v29  ;;  %v676_v32 = vpop.f32.mrb[4].mxu1  ;;  %v805_v28 = vld [vmem:[#allocation2 + $0x10] sm:$0xff] (!%p1028_p12)  ;;  %v806_v29 = vld [vmem:[#allocation2 + $0x18] sm:$0xff] (!%p1028_p12) }
 0x27e   : > { %v747_v33 = vadd.f32 %v676_v32, %v522_v30  ;;  %v678_v34 = vpop.f32.mrb[5].mxu1  ;;  %835 = vst [vmem:[%s1877_s24] sm:$0xff] (!%p1028_p12), %v803_v26  ;;  %836 = vst [vmem:[%s1877_s24 + $0x8] sm:$0xff] (!%p1028_p12), %v804_v27 }
 0x27f   : > { %v748_v35 = vadd.f32 %v678_v34, %v523_v31  ;;  %837 = vst [vmem:[%s1877_s24 + $0x10] sm:$0xff] (!%p1028_p12), %v805_v28  ;;  %v807_v30 = vld [vmem:[#allocation2 + $0x20] sm:$0xff] (!%p1028_p12)  ;;  %838 = vst [vmem:[%s1877_s24 + $0x18] sm:$0xff] (!%p1028_p12), %v806_v29 }
 0x280   : > { %779 = vst [vmem:[#allocation2 + $0x60] sm:$0xff] %v747_v33  ;;  %v808_v31 = vld [vmem:[#allocation2 + $0x28] sm:$0xff] (!%p1028_p12)  ;;  %839 = vst [vmem:[%s1877_s24 + $0x20] sm:$0xff] (!%p1028_p12), %v807_v30  ;;  %v811_v34 = vld [vmem:[#allocation2 + $0x40] sm:$0xff] (!%p1028_p12) }
 0x281   : > { %780 = vst [vmem:[#allocation2 + $0x68] sm:$0xff] %v748_v35  ;;  %v682_v38 = vpop.f32.mrb[6].mxu1  ;;  %840 = vst [vmem:[%s1877_s24 + $0x28] sm:$0xff] (!%p1028_p12), %v808_v31  ;;  %v812_v35 = vld [vmem:[#allocation2 + $0x48] sm:$0xff] (!%p1028_p12) }
 0x282   : > { %v749_v39 = vadd.f32 %v682_v38, %v524_v36  ;;  %v684_v40 = vpop.f32.mrb[7].mxu1  ;;  %843 = vst [vmem:[%s1877_s24 + $0x40] sm:$0xff] (!%p1028_p12), %v811_v34  ;;  %844 = vst [vmem:[%s1877_s24 + $0x48] sm:$0xff] (!%p1028_p12), %v812_v35 }
 0x283   : > { %v750_v41 = vadd.f32 %v684_v40, %v525_v37  ;;  %v809_v32 = vld [vmem:[#allocation2 + $0x30] sm:$0xff] (!%p1028_p12) }
 0x284   : > { %781 = vst [vmem:[#allocation2 + $0x70] sm:$0xff] %v749_v39  ;;  %v810_v33 = vld [vmem:[#allocation2 + $0x38] sm:$0xff] (!%p1028_p12)  ;;  %841 = vst [vmem:[%s1877_s24 + $0x30] sm:$0xff] (!%p1028_p12), %v809_v32  ;;  %v813_v36 = vld [vmem:[#allocation2 + $0x50] sm:$0xff] (!%p1028_p12) }
 0x285   : > { %782 = vst [vmem:[#allocation2 + $0x78] sm:$0xff] %v750_v41  ;;  %v688_v44 = vpop.f32.mrb[8].mxu1  ;;  %842 = vst [vmem:[%s1877_s24 + $0x38] sm:$0xff] (!%p1028_p12), %v810_v33  ;;  %v814_v37 = vld [vmem:[#allocation2 + $0x58] sm:$0xff] (!%p1028_p12) }
 0x286   : > { %v751_v45 = vadd.f32 %v688_v44, %v526_v42  ;;  %v690_v46 = vpop.f32.mrb[9].mxu1  ;;  %845 = vst [vmem:[%s1877_s24 + $0x50] sm:$0xff] (!%p1028_p12), %v813_v36  ;;  %846 = vst [vmem:[%s1877_s24 + $0x58] sm:$0xff] (!%p1028_p12), %v814_v37 }
 0x287   : > { %v752_v47 = vadd.f32 %v690_v46, %v527_v43  ;;  %v815_v38 = vld [vmem:[#allocation2 + $0x60] sm:$0xff] (!%p1028_p12) }
 0x288   : > { %783 = vst [vmem:[#allocation2 + $0x80] sm:$0xff] %v751_v45  ;;  %v816_v39 = vld [vmem:[#allocation2 + $0x68] sm:$0xff] (!%p1028_p12)  ;;  %847 = vst [vmem:[%s1877_s24 + $0x60] sm:$0xff] (!%p1028_p12), %v815_v38 }
 0x289   : > { %784 = vst [vmem:[#allocation2 + $0x88] sm:$0xff] %v752_v47  ;;  %v694_v50 = vpop.f32.mrb[10].mxu1  ;;  %848 = vst [vmem:[%s1877_s24 + $0x68] sm:$0xff] (!%p1028_p12), %v816_v39 }
 0x28a   : > { %v753_v51 = vadd.f32 %v694_v50, %v528_v48  ;;  %v696_v52 = vpop.f32.mrb[11].mxu1 }
 0x28b   : > { %v754_v53 = vadd.f32 %v696_v52, %v529_v49  ;;  %v817_v40 = vld [vmem:[#allocation2 + $0x70] sm:$0xff] (!%p1028_p12) }
 0x28c   : > { %785 = vst [vmem:[#allocation2 + $0x90] sm:$0xff] %v753_v51  ;;  %849 = vst [vmem:[%s1877_s24 + $0x70] sm:$0xff] (!%p1028_p12), %v817_v40  ;;  %v818_v41 = vld [vmem:[#allocation2 + $0x78] sm:$0xff] (!%p1028_p12) }
 0x28d   : > { %786 = vst [vmem:[#allocation2 + $0x98] sm:$0xff] %v754_v53  ;;  %v700_v56 = vpop.f32.mrb[12].mxu1  ;;  %850 = vst [vmem:[%s1877_s24 + $0x78] sm:$0xff] (!%p1028_p12), %v818_v41 }
 0x28e   : > { %v755_v57 = vadd.f32 %v700_v56, %v530_v54  ;;  %v702_v58 = vpop.f32.mrb[13].mxu1 }
 0x28f   : > { %v756_v59 = vadd.f32 %v702_v58, %v531_v55  ;;  %v819_v42 = vld [vmem:[#allocation2 + $0x80] sm:$0xff] (!%p1028_p12) }
 0x290   : > { %787 = vst [vmem:[#allocation2 + $0xa0] sm:$0xff] %v755_v57  ;;  %v820_v43 = vld [vmem:[#allocation2 + $0x88] sm:$0xff] (!%p1028_p12)  ;;  %851 = vst [vmem:[%s1877_s24 + $0x80] sm:$0xff] (!%p1028_p12), %v819_v42 }
 0x291   : > { %788 = vst [vmem:[#allocation2 + $0xa8] sm:$0xff] %v756_v59  ;;  %v706_v62 = vpop.f32.mrb[14].mxu1  ;;  %852 = vst [vmem:[%s1877_s24 + $0x88] sm:$0xff] (!%p1028_p12), %v820_v43 }
 0x292   : > { %v757_v63 = vadd.f32 %v706_v62, %v532_v60  ;;  %v708_v0 = vpop.f32.mrb[15].mxu1 }
 0x293   : > { %v758_v1 = vadd.f32 %v708_v0, %v533_v61  ;;  %v821_v44 = vld [vmem:[#allocation2 + $0x90] sm:$0xff] (!%p1028_p12) }
 0x294   : > { %789 = vst [vmem:[#allocation2 + $0xb0] sm:$0xff] %v757_v63  ;;  %v822_v45 = vld [vmem:[#allocation2 + $0x98] sm:$0xff] (!%p1028_p12)  ;;  %853 = vst [vmem:[%s1877_s24 + $0x90] sm:$0xff] (!%p1028_p12), %v821_v44 }
 0x295   : > { %790 = vst [vmem:[#allocation2 + $0xb8] sm:$0xff] %v758_v1  ;;  %v712_v4 = vpop.f32.mrb[16].mxu1  ;;  %854 = vst [vmem:[%s1877_s24 + $0x98] sm:$0xff] (!%p1028_p12), %v822_v45 }
 0x296   : > { %v759_v5 = vadd.f32 %v712_v4, %v534_v2  ;;  %v714_v6 = vpop.f32.mrb[17].mxu1 }
 0x297   : > { %v760_v7 = vadd.f32 %v714_v6, %v535_v3  ;;  %v823_v46 = vld [vmem:[#allocation2 + $0xa0] sm:$0xff] (!%p1028_p12) }
 0x298   : > { %791 = vst [vmem:[#allocation2 + $0xc0] sm:$0xff] %v759_v5  ;;  %855 = vst [vmem:[%s1877_s24 + $0xa0] sm:$0xff] (!%p1028_p12), %v823_v46  ;;  %v824_v47 = vld [vmem:[#allocation2 + $0xa8] sm:$0xff] (!%p1028_p12) }
 0x299   : > { %792 = vst [vmem:[#allocation2 + $0xc8] sm:$0xff] %v760_v7  ;;  %v718_v10 = vpop.f32.mrb[18].mxu1  ;;  %856 = vst [vmem:[%s1877_s24 + $0xa8] sm:$0xff] (!%p1028_p12), %v824_v47 }
 0x29a   : > { %v761_v11 = vadd.f32 %v718_v10, %v536_v8  ;;  %v720_v12 = vpop.f32.mrb[19].mxu1 }
 0x29b   : > { %v762_v13 = vadd.f32 %v720_v12, %v537_v9  ;;  %v825_v48 = vld [vmem:[#allocation2 + $0xb0] sm:$0xff] (!%p1028_p12) }
 0x29c   : > { %793 = vst [vmem:[#allocation2 + $0xd0] sm:$0xff] %v761_v11  ;;  %v826_v49 = vld [vmem:[#allocation2 + $0xb8] sm:$0xff] (!%p1028_p12)  ;;  %857 = vst [vmem:[%s1877_s24 + $0xb0] sm:$0xff] (!%p1028_p12), %v825_v48 }
 0x29d   : > { %794 = vst [vmem:[#allocation2 + $0xd8] sm:$0xff] %v762_v13  ;;  %v724_v16 = vpop.f32.mrb[20].mxu1  ;;  %858 = vst [vmem:[%s1877_s24 + $0xb8] sm:$0xff] (!%p1028_p12), %v826_v49 }
 0x29e   : > { %v763_v17 = vadd.f32 %v724_v16, %v538_v14  ;;  %v726_v18 = vpop.f32.mrb[21].mxu1 }
 0x29f   : > { %v764_v19 = vadd.f32 %v726_v18, %v539_v15  ;;  %802 = sbr.rel (%p1028_p12) target bundleno = 686 (0x2ae), region = 52  ;;  %v827_v50 = vld [vmem:[#allocation2 + $0xc0] sm:$0xff] (!%p1028_p12) }
 0x2a0   : > { %795 = vst [vmem:[#allocation2 + $0xe0] sm:$0xff] %v763_v17  ;;  %v828_v51 = vld [vmem:[#allocation2 + $0xc8] sm:$0xff] (!%p1028_p12)  ;;  %859 = vst [vmem:[%s1877_s24 + $0xc0] sm:$0xff] (!%p1028_p12), %v827_v50 }
 0x2a1   : > { %796 = vst [vmem:[#allocation2 + $0xe8] sm:$0xff] %v764_v19  ;;  %v730_v22 = vpop.f32.mrb[22].mxu1  ;;  %860 = vst [vmem:[%s1877_s24 + $0xc8] sm:$0xff] (!%p1028_p12), %v828_v51 }
 0x2a2   : > { %v765_v23 = vadd.f32 %v730_v22, %v540_v20  ;;  %v732_v24 = vpop.f32.mrb[23].mxu1 }
 0x2a3   : > { %v766_v25 = vadd.f32 %v732_v24, %v541_v21  ;;  %v829_v52 = vld [vmem:[#allocation2 + $0xd0] sm:$0xff] (!%p1028_p12) }
 0x2a4   : > { %797 = vst [vmem:[#allocation2 + $0xf0] sm:$0xff] %v765_v23  ;;  %861 = vst [vmem:[%s1877_s24 + $0xd0] sm:$0xff] (!%p1028_p12), %v829_v52  ;;  %v830_v53 = vld [vmem:[#allocation2 + $0xd8] sm:$0xff] (!%p1028_p12) }
 0x2a5   : > { %798 = vst [vmem:[#allocation2 + $0xf8] sm:$0xff] %v766_v25  ;;  %862 = vst [vmem:[%s1877_s24 + $0xd8] sm:$0xff] (!%p1028_p12), %v830_v53 }
 0x2a7   : > { %v831_v54 = vld [vmem:[#allocation2 + $0xe0] sm:$0xff] }
 0x2a8   : > { %v832_v55 = vld [vmem:[#allocation2 + $0xe8] sm:$0xff]  ;;  %863 = vst [vmem:[%s1877_s24 + $0xe0] sm:$0xff] %v831_v54 }
 0x2a9   : > { %864 = vst [vmem:[%s1877_s24 + $0xe8] sm:$0xff] %v832_v55 }
 0x2ab   : > { %v833_v56 = vld [vmem:[#allocation2 + $0xf0] sm:$0xff] }
 0x2ac   : > { %v834_v57 = vld [vmem:[#allocation2 + $0xf8] sm:$0xff]  ;;  %865 = vst [vmem:[%s1877_s24 + $0xf0] sm:$0xff] %v833_v56 }
 0x2ad   : > { %866 = vst [vmem:[%s1877_s24 + $0xf8] sm:$0xff] %v834_v57 }
 0x2ae PF: > { %s1039_s18 = sshll.u32 %s1532_s19, 12  ;;  %s2117_s8 = sld [smem:[#allocation20_spill]] }
 0x2af   : > { %s882_s25 = sshll.u32 %s1877_s24, 4  ;;  %s868_s17 = scalar_lea.sflag [#allocation5], %s1856_s26  ;;  %s2004_s25 = int_to_ptr.vmem [resolvable:$true] %s882_s25 }
 0x2b0   : > { %s1418_s30 = scalar_lea.vmem %s2004_s25, 4096  ;;  %p2118_p11 = scmp.ne.s32.totalorder %s2103_s4, 0 }
 0x2b1   : > { %p1419_p13 = scmp.ne.s32.totalorder %s2004_s25, %s1418_s30  ;;  %s1555_s3 = smov [#allocation9]  }
 0x2b2   : > { %s1422_s28 = sshll.u32 %s1555_s3, 4  ;;  %s1423_s28 = int_to_ptr.vmem [resolvable:$false] %s1422_s28 }
 0x2b3   : > { %p1420_p6 = pnand %p1419_p13, %p2118_p11  ;;  %s1424_s19 = scalar_lea.vmem %s1423_s28, 8192 }
 0x2b4   : > { %s2001_s5 = scalar_lea.hbm %s2117_s8, %s1039_s18  ;;  %p1425_p5 = scmp.lt.s32.totalorder %s2004_s25, %s1423_s28 }
 0x2b5   : > { %p1421_p10 = pneg %p1420_p6  ;;  %p1426_p1 = scmp.lt.s32.totalorder %s1424_s19, %s1418_s30 }
 0x2b7   : > { %p1427_p0 = por %p1426_p1, %p1425_p5 }
 0x2b9   : > { %p1428_p9 = pnand %p1427_p0, %p1421_p10 }
 0x2bb   : > { %1431 = shalt.err (!%p1428_p9)
}
 0x2bc   : > { %s1432_s10 = scalar_lea.hbm %s2001_s5, 4096  ;;  %s1436_s21 = scalar_lea.hbm %s2117_s8, 8192 }
 0x2bd   : > { %p1433_p2 = scmp.ne.s32.totalorder %s2001_s5, %s1432_s10  ;;  %p1437_p7 = scmp.lt.u32.totalorder %s2001_s5, %s2117_s8 }
 0x2be   : > { %p1438_p8 = scmp.lt.u32.totalorder %s1436_s21, %s1432_s10  ;;  %p1440_p13 = scmp.lt.u32.totalorder %s1432_s10, %s2001_s5 }
 0x2bf   : > { %p1434_p3 = pnand %p1433_p2, %p2118_p11 }
 0x2c0   : > { %p1439_p12 = por %p1438_p8, %p1437_p7 }
 0x2c1   : > { %p1435_p4 = pneg %p1434_p3 }
 0x2c2   : > { %p1441_p6 = por %p1440_p13, %p1439_p12 }
 0x2c4   : > { %p1442_p10 = pnand %p1441_p6, %p1435_p4 }
 0x2c6   : > { %1445 = shalt.err (!%p1442_p10)
}
 0x2c7   : > { %s1556_s1 = smov 256   ;;  %s1557_s12 = smov 16  }
 0x2c8   : > { %1214 = dma.vmem_to_hbm [thread:$0]  (%p2118_p11), %s2004_s25, 4096, %s2001_s5, %s868_s17, %s1556_s1, %s1556_s1, %s1557_s12  }
 0x2c9 PF: > { %p1231_p5 = scmp.ge.s32.totalorder %s1544_s22, 2  ;;  %s897_s24 = sand.u32 1, %s1516_s15  }
 0x2ca   : > { %p2119_p1 = scmp.ne.s32.totalorder %s2105_s23, 0  ;;  %s898_s18 = scalar_lea.sflag [#allocation5], %s897_s24 }
 0x2cc   : > { %p1227_p0 = pnand %p1231_p5, %p2119_p1 }
 0x2ce   : > { %1499 = dma.done.wait (!%p1227_p0), %s898_s18, 4096  }
 0x2cf   : > { %1501 = vsyncadd (!%p1227_p0), %s898_s18, 4294963200  ;;  %s22_s22 = sadd.s32 1, %s1544_s22   ;;  %s2120_s27 = sld [smem:[#allocation16_spill]] }
 0x2d0   : > { %p19_p9 = scmp.ge.s32.totalorder %s22_s22, 6   ;;  %s2121_s4 = sld [smem:[#allocation13_spill]] }
 0x2d1   : > { %s2122_s17 = sld [smem:[#allocation18_spill]]  ;;  %s2123_s19 = sld [smem:[#allocation14_spill]] }
 0x2d2   : > { %s2124_s26 = sld [smem:[#allocation15_spill]]  ;;  %s2125_s21 = sld [smem:[#allocation17_spill]] }
 0x2d3   : > { %s2126_s12 = smov %s1508_s13  ;;  %s2127_s13 = smov %s1512_s14 }
 0x2d4   : > { %s2129_s15 = smov %s1520_s16  ;;  %s2131_s18 = smov %s1536_s20 }
 0x2d5   : > { %s2128_s14 = smov %s2120_s27  ;;  %21 = sbr.rel (!%p19_p9) target bundleno = 14 (0xe), region = 109 }
 0x2d6   : > { %s2130_s16 = smov %s2121_s4 }
 0x2d8   : > { %s2132_s20 = smov %s2124_s26 }
 0x2dc   :  { %903 = vsyncpa [#allocation4], 1 }
 0x2dd   :  { %905 = vsyncpa [#allocation4 + $0x1], 1 }
 0x2de   :  { %906 = vsyncpa [#allocation7], 1 }
 0x2df   :  { %908 = vsyncpa [#allocation7 + $0x1], 1 }
 0x2e0   :  { %909 = vsyncpa [#allocation5], 1 }
 0x2e1   :  { %911 = vsyncpa [#allocation5 + $0x1], 1 }

</bundles_post_ra>
